<compile_context>
chip_gen: v7x
topology: tpu7x:2x2x1
jax: 0.10.0
libtpu: 0.0.40
codegen_flags: <defaults>
</compile_context>

<pallas_src>
import functools

import jax
import jax.numpy as jnp
from jax.experimental import pallas as pl
from jax.experimental.pallas import tpu as pltpu


def _conv1x1_nchw_kernel(x_ref, w_ref, b_ref, o_ref):
    # x_ref: (1, C_in, t_hw)   spatial tile on lanes, channels on sublanes
    # w_ref: (C_out, C_in)     full weight matrix (tiny, resident every step)
    # b_ref: (C_out, 1)
    # o_ref: (1, C_out, t_hw)  lane dim = t_hw -> unmasked full-width stores
    acc = jnp.dot(w_ref[...], x_ref[0], preferred_element_type=jnp.float32)
    o_ref[0] = (acc + b_ref[...]).astype(o_ref.dtype)


def patch_unembed(x, weight, bias, *, patch_size, out_chans):
    """PatchUnEmbed forward (kernel_size=1 path).

    x:      (N, embed_dim, H, W)  NCHW, float32
    weight: (C_out, embed_dim, 1, 1) with C_out = out_chans * patch_size**2
    bias:   (C_out,)
    returns (N, out_chans, H*patch_size, W*patch_size) NCHW.
    """
    N, C_in, H, W = x.shape
    C_out = weight.shape[0]
    assert C_out == out_chans * patch_size * patch_size

    HW = H * W
    # Flatten trailing spatial dims: free (contiguous) reshape, stays NCHW.
    x2 = x.reshape(N, C_in, HW)
    wm = weight.reshape(C_out, C_in)
    bm = bias.reshape(C_out, 1)

    # Spatial tile: as big as VMEM comfortably allows (mem-bound kernel),
    # a multiple of 128 lanes (or the full HW when HW <= 128).
    if HW <= 128:
        t_hw = HW                                   # "equals full dim" exception
    else:
        t_hw = min(8192, (HW // 128) * 128)         # multiple of 128
    grid = (N, pl.cdiv(HW, t_hw))

    y2 = pl.pallas_call(
        _conv1x1_nchw_kernel,
        out_shape=jax.ShapeDtypeStruct((N, C_out, HW), x.dtype),
        grid_spec=pltpu.PrefetchScalarGridSpec(
            num_scalar_prefetch=0,
            grid=grid,
            in_specs=[
                pl.BlockSpec((1, C_in, t_hw), lambda n, j: (n, 0, j)),
                pl.BlockSpec((C_out, C_in), lambda n, j: (0, 0)),
                pl.BlockSpec((C_out, 1), lambda n, j: (0, 0)),
            ],
            out_specs=pl.BlockSpec((1, C_out, t_hw), lambda n, j: (n, 0, j)),
        ),
        compiler_params=pltpu.CompilerParams(
            dimension_semantics=("parallel", "parallel")),
    )(x2, wm, bm)

    # PixelShuffle(p): (N, c*p*p, H, W) -> (N, c, H*p, W*p).  One fused XLA
    # reshape/transpose/reshape pass (no extra NHWC->NCHW transpose needed).
    p = patch_size
    y = y2.reshape(N, out_chans, p, p, H, W)
    y = y.transpose(0, 1, 4, 2, 5, 3)
    return y.reshape(N, out_chans, H * p, W * p)


def _reference(x, weight, bias, *, patch_size, out_chans):
    # Pure-JAX reference for the same forward pass.
    N, C_in, H, W = x.shape
    C_out = weight.shape[0]
    y = jnp.einsum("nchw,oc->nohw", x, weight.reshape(C_out, C_in)) \
        + bias[None, :, None, None]
    p = patch_size
    y = y.reshape(N, out_chans, p, p, H, W).transpose(0, 1, 4, 2, 5, 3)
    return y.reshape(N, out_chans, H * p, W * p)


if __name__ == "__main__":
    patch_size = 4
    out_chans = 3
    embed_dim = 32
    N, H, W = 2, 16, 16
    C_out = out_chans * patch_size * patch_size

    key = jax.random.PRNGKey(0)
    kx, kw, kb = jax.random.split(key, 3)
    x = jax.random.normal(kx, (N, embed_dim, H, W), dtype=jnp.float32)
    # Deterministic synthetic parameters (Conv2d(embed_dim, C_out, 1) shapes).
    weight = jax.random.normal(kw, (C_out, embed_dim, 1, 1), dtype=jnp.float32) * 0.05
    bias = jax.random.normal(kb, (C_out,), dtype=jnp.float32) * 0.05

    fwd = jax.jit(functools.partial(
        patch_unembed, patch_size=patch_size, out_chans=out_chans))
    out = jax.block_until_ready(fwd(x, weight, bias))

    ref = _reference(x, weight, bias, patch_size=patch_size, out_chans=out_chans)
    assert out.shape == (N, out_chans, H * patch_size, W * patch_size), out.shape
    assert jnp.allclose(out, ref, atol=1e-4, rtol=1e-4), "mismatch vs reference"

    print("KERNEL_OK")
</pallas_src>

<mosaic_0001>
module attributes {stable_mosaic.version = 11 : i64} {
  func.func @_conv1x1_nchw_kernel(%arg0: i32, %arg1: i32, %arg2: memref<1x32x256xf32, #tpu.memory_space<vmem>>, %arg3: memref<48x32xf32, #tpu.memory_space<vmem>>, %arg4: memref<48x1xf32, #tpu.memory_space<vmem>>, %arg5: memref<1x48x256xf32, #tpu.memory_space<vmem>>) attributes {dimension_semantics = [#tpu.dimension_semantics<parallel>, #tpu.dimension_semantics<parallel>], iteration_bounds = array<i64: 2, 1>, scalar_prefetch = 0 : i64, scratch_operands = 0 : i64, tpu.core_type = #tpu.core_type<tc>, window_params = [{transform_indices = @transform_0, window_bounds = array<i64: 1, 32, 256>}, {pipeline_mode = #tpu.pipeline_mode<synchronous>, transform_indices = @transform_1, window_bounds = array<i64: 48, 32>}, {pipeline_mode = #tpu.pipeline_mode<synchronous>, transform_indices = @transform_2, window_bounds = array<i64: 48, 1>}, {transform_indices = @transform_3, window_bounds = array<i64: 1, 48, 256>}]} {
    %c0 = arith.constant 0 : index
    %c0_0 = arith.constant 0 : index
    %0 = vector.load %arg3[%c0, %c0_0] : memref<48x32xf32, #tpu.memory_space<vmem>>, vector<48x32xf32>
    %c0_1 = arith.constant 0 : index
    %c0_2 = arith.constant 0 : index
    %c0_3 = arith.constant 0 : index
    %1 = vector.load %arg2[%c0_1, %c0_2, %c0_3] : memref<1x32x256xf32, #tpu.memory_space<vmem>>, vector<1x32x256xf32>
    %2 = vector.shape_cast %1 : vector<1x32x256xf32> to vector<32x256xf32>
    %cst = arith.constant dense<0.000000e+00> : vector<48x256xf32>
    %3 = tpu.matmul %0, %2, %cst {dimension_numbers = #tpu.dot_dimension_numbers<[1], [0], [0], [1], [0, 0, 1, 1], [], []>} : vector<48x32xf32>, vector<32x256xf32>, vector<48x256xf32> -> vector<48x256xf32>
    %c0_4 = arith.constant 0 : index
    %c0_5 = arith.constant 0 : index
    %4 = vector.load %arg4[%c0_4, %c0_5] : memref<48x1xf32, #tpu.memory_space<vmem>>, vector<48x1xf32>
    %5 = vector.broadcast %4 : vector<48x1xf32> to vector<48x256xf32>
    %6 = arith.addf %3, %5 : vector<48x256xf32>
    %c0_6 = arith.constant 0 : index
    %c0_7 = arith.constant 0 : index
    %c0_8 = arith.constant 0 : index
    %7 = vector.load %arg5[%c0_6, %c0_7, %c0_8] : memref<1x48x256xf32, #tpu.memory_space<vmem>>, vector<1x48x256xf32>
    %8 = vector.shape_cast %7 : vector<1x48x256xf32> to vector<48x256xf32>
    %9 = vector.shape_cast %6 : vector<48x256xf32> to vector<1x48x256xf32>
    tpu.vector_store %arg5[%c0_6, %c0_7, %c0_8], %9 {strides = array<i32>} : memref<1x48x256xf32, #tpu.memory_space<vmem>>, vector<1x48x256xf32>,
    return
  }
  func.func @transform_0(%arg0: i32, %arg1: i32) -> (i32, i32, i32) {
    %c0_i32 = arith.constant 0 : i32
    %c0_i32_0 = arith.constant 0 : i32
    return %arg0, %c0_i32, %arg1 : i32, i32, i32
  }
  func.func @transform_1(%arg0: i32, %arg1: i32) -> (i32, i32) {
    %c0_i32 = arith.constant 0 : i32
    %c0_i32_0 = arith.constant 0 : i32
    %c0_i32_1 = arith.constant 0 : i32
    return %c0_i32, %c0_i32_0 : i32, i32
  }
  func.func @transform_2(%arg0: i32, %arg1: i32) -> (i32, i32) {
    %c0_i32 = arith.constant 0 : i32
    %c0_i32_0 = arith.constant 0 : i32
    %c0_i32_1 = arith.constant 0 : i32
    return %c0_i32, %c0_i32_0 : i32, i32
  }
  func.func @transform_3(%arg0: i32, %arg1: i32) -> (i32, i32, i32) {
    %c0_i32 = arith.constant 0 : i32
    %c0_i32_0 = arith.constant 0 : i32
    return %arg0, %c0_i32, %arg1 : i32, i32, i32
  }
}

</mosaic_0001>

<bundles_post_ra>
// kernel: patch_unembed.1
= control target key start
LH: loop header
LB: loop body
LE: loop exit
PB: predicated region body
PF: predicated region fallthrough
CT: control target
= control target key end

     0   :  { %s583_s12 = smov 0   ;;  %s585_s13 = smov 0   ;;  %s670_s0 = inlined_call_operand.vmem [shape: f32[2,32,256], index: 0, kind: input, shape index: {}]   ;;  %s671_s1 = inlined_call_operand.vmem [shape: f32[48,32], index: 1, kind: input, shape index: {}]   ;;  %s672_s2 = inlined_call_operand.vmem [shape: f32[48,1], index: 2, kind: input, shape index: {}]   ;;  %s673_s3 = inlined_call_operand.vmem [shape: f32[2,48,256], index: 3, kind: output, shape index: {}]  }
   0x1   :  { %s587_s14 = smov 0  }
   0x2 LB: > { %s25_s15 = sadd.s32 1, %s555_s13  ;;  %p483_p0 = scmp.ge.s32.totalorder %s559_s14, 1  ;;  %s559_s14 = sphi %s587_s14, %s13_s14   ;;  %s555_s13 = sphi %s585_s13, %s675_s13   ;;  %s551_s12 = sphi %s583_s12, %s674_s12  }
   0x3   : > { %p27_p1 = scmp.ge.s32.totalorder %s25_s15, 2  ;;  %p158_p2 = scmp.lt.s32.totalorder %s559_s14, 3 }
   0x5   : > { %s677_s15 = smov (%p27_p1, %s25_s15), 0  ;;  %p159_p3 = pnand %p483_p0, %p158_p2 }
   0x6   : > { %p191_p4 = scmp.lt.s32.totalorder (!%p159_p3), %s551_s12, 1  ;;  %v561_v0 = vmov (!%p159_p3), 0.0   ;;  %v562_v1 = vmov (!%p159_p3), 0   ;;  %v226_v2 = vld [vmem:[%s672_s2 + $0x10] sm:$0xff] (!%p159_p3)  ;;  %v224_v3 = vld [vmem:[%s672_s2] sm:$0xff] (!%p159_p3)  ;;  %v227_v4 = vld [vmem:[%s672_s2 + $0x18] sm:$0xff] (!%p159_p3) }
   0x7   : > { %162 = sbr.rel (%p159_p3) target bundleno = 252 (0xfc), region = 32  ;;  %343 = vmatprep.mubr.f32.mxu0 (!%p159_p3), %v561_v0  ;;  %361 = vmatprep.mubr.f32.mxu1 (!%p159_p3), %v561_v0  ;;  %v225_v5 = vld [vmem:[%s672_s2 + $0x8] sm:$0xff] (!%p159_p3)  ;;  %v228_v18 = vld [vmem:[%s672_s2 + $0x20] sm:$0xff] (!%p159_p3)  ;;  %vm260_vm0 = vcmask (!%p159_p3), 261120   ;;  %v213_v21 = vld [vmem:[%s671_s1 + $0x18] sm:$0xff] (!%p159_p3) }
   0x8   : > { %536 = vset.pattern.permute.xlu1 (!%p159_p3), %v562_v1  ;;  %535 = vset.pattern.permute.xlu0 (!%p159_p3), %v562_v1  ;;  %v229_v17 = vld [vmem:[%s672_s2 + $0x28] sm:$0xff] (!%p159_p3)  ;;  %v210_v20 = vld [vmem:[%s671_s1] sm:$0xff] (!%p159_p3)  ;;  %v212_v24 = vld [vmem:[%s671_s1 + $0x10] sm:$0xff] (!%p159_p3) }
   0x9   : > { %242 = vperm.xlu1 (!%p159_p3), %536, %v226_v2   ;;  %232 = vperm.xlu0 (!%p159_p3), %535, %v224_v3   ;;  %v211_v22 = vld [vmem:[%s671_s1 + $0x8] sm:$0xff] (!%p159_p3)  ;;  %v214_v23 = vld [vmem:[%s671_s1 + $0x20] sm:$0xff] (!%p159_p3) }
   0xa   : > { %v215_v25 = vld [vmem:[%s671_s1 + $0x28] sm:$0xff] (!%p159_p3) }
   0xd   : > { %247 = vperm.xlu1 (!%p159_p3), %536, %v227_v4   ;;  %237 = vperm.xlu0 (!%p159_p3), %535, %v225_v5  }
   0xe   : > { %s679_s12 = smov (!%p191_p4, %s551_s12), 1 }
   0xf   : > { %s495_s20 = sshll.u32 %s679_s12, 6  ;;  %s508_s21 = smul.u32 96, %s679_s12 }
  0x10   : > { %s198_s27 = scalar_lea.vmem %s670_s0, %s495_s20 }
  0x11   : > { %v217_v6 = vld [vmem:[%s198_s27 + $0x8] sm:$0xff]  ;;  %v219_v7 = vld [vmem:[%s198_s27 + $0x18] sm:$0xff]  ;;  %v216_v8 = vld [vmem:[%s198_s27] sm:$0xff]  ;;  %257 = vperm.xlu1 %536, %v229_v17   ;;  %252 = vperm.xlu0 %535, %v228_v18   ;;  %s647_s24 = scalar_lea.vmem %s673_s3, %s508_s21 }
  0x12   : > { %v496_v9 = vpack.c.bf16 %v219_v7, %v217_v6  ;;  %v218_v10 = vld [vmem:[%s198_s27 + $0x10] sm:$0xff]  ;;  %v221_v11 = vld [vmem:[%s198_s27 + $0x28] sm:$0xff]  ;;  %v223_v12 = vld [vmem:[%s198_s27 + $0x38] sm:$0xff] }
  0x13   : > { %v498_v13 = vpack.c.bf16 %v218_v10, %v216_v8  ;;  %v500_v14 = vpack.c.bf16 %v223_v12, %v221_v11  ;;  %v220_v15 = vld [vmem:[%s198_s27 + $0x20] sm:$0xff]  ;;  %v222_v16 = vld [vmem:[%s198_s27 + $0x30] sm:$0xff] }
  0x14   : > { %497 = vmatprep.subr.bf16.mxu0 %v496_v9  ;;  %504 = vmatprep.subr.bf16.mxu1 %v496_v9  ;;  %v502_v19 = vpack.c.bf16 %v222_v16, %v220_v15 }
  0x15   : > { %499 = vmatpush1.bf16.msra.mxu0 %v498_v13  ;;  %506 = vmatpush1.bf16.msra.mxu1 %v498_v13 }
  0x16   : > { %501 = vmatprep.subr.bf16.mxu0 %v500_v14  ;;  %505 = vmatprep.subr.bf16.mxu1 %v500_v14 }
  0x19   : > { %503 = vmatpush1.bf16.msra.mxu0 %v502_v19  ;;  %507 = vmatpush1.bf16.msra.mxu1 %v502_v19 }
  0x1c   : > { %487 = vmatmul.mubr.msk.f32.vlgmr.msra.gmra.mrb[0].mxu0 %vm260_vm0, %v210_v20  ;;  %490 = vmatmul.mubr.msk.f32.vlgmr.msra.gmra.mrb[0].mxu1 %vm260_vm0, %v213_v21 }
  0x1d   : > { %349 = vmatprep.mubr.f32.mxu0 %v561_v0  ;;  %367 = vmatprep.mubr.f32.mxu1 %v561_v0 }
  0x20   : > { %488 = vmatmul.mubr.msk.f32.gmra.mrb[2].mxu0 %vm260_vm0, %v211_v22  ;;  %491 = vmatmul.mubr.msk.f32.gmra.mrb[2].mxu1 %vm260_vm0, %v214_v23 }
  0x21   : > { %355 = vmatprep.mubr.f32.mxu0 %v561_v0  ;;  %373 = vmatprep.mubr.f32.mxu1 %v561_v0 }
  0x24   : > { %489 = vmatmul.mubr.msk.f32.gmra.mrb[4].mxu0 %vm260_vm0, %v212_v24  ;;  %492 = vmatmul.mubr.msk.f32.gmra.mrb[4].mxu1 %vm260_vm0, %v215_v25 }
  0x88   : > { %v233_v26 = vpop.permute.xlu0 %232  ;;  %v243_v27 = vpop.permute.xlu1 %242 }
  0x8c   : > { %v238_v28 = vpop.permute.xlu0 %237  ;;  %v248_v29 = vpop.permute.xlu1 %247 }
  0x90   : > { %v253_v38 = vpop.permute.xlu0 %252  ;;  %v258_v47 = vpop.permute.xlu1 %257 }
  0xef   : > { %v345_v30 = vpop.f32.mrb[0].mxu0  ;;  %v363_v31 = vpop.f32.mrb[0].mxu1 }
  0xf0   : > { %v346_v32 = vadd.f32 %v345_v30, %v233_v26  ;;  %v364_v33 = vadd.f32 %v363_v31, %v248_v29  ;;  %v347_v34 = vpop.f32.mrb[1].mxu0  ;;  %v365_v35 = vpop.f32.mrb[1].mxu1 }
  0xf1   : > { %v348_v36 = vadd.f32 %v347_v34, %v233_v26  ;;  %v366_v37 = vadd.f32 %v365_v35, %v248_v29 }
  0xf2   : > { %380 = vst [vmem:[%s647_s24] sm:$0xff] %v346_v32  ;;  %386 = vst [vmem:[%s647_s24 + $0x30] sm:$0xff] %v364_v33 }
  0xf3   : > { %381 = vst [vmem:[%s647_s24 + $0x8] sm:$0xff] %v348_v36  ;;  %387 = vst [vmem:[%s647_s24 + $0x38] sm:$0xff] %v366_v37  ;;  %v351_v39 = vpop.f32.mrb[2].mxu0  ;;  %v369_v40 = vpop.f32.mrb[2].mxu1 }
  0xf4   : > { %v352_v41 = vadd.f32 %v351_v39, %v238_v28  ;;  %v370_v42 = vadd.f32 %v369_v40, %v253_v38  ;;  %v353_v43 = vpop.f32.mrb[3].mxu0  ;;  %v371_v44 = vpop.f32.mrb[3].mxu1 }
  0xf5   : > { %v354_v45 = vadd.f32 %v353_v43, %v238_v28  ;;  %v372_v46 = vadd.f32 %v371_v44, %v253_v38 }
  0xf6   : > { %382 = vst [vmem:[%s647_s24 + $0x10] sm:$0xff] %v352_v41  ;;  %388 = vst [vmem:[%s647_s24 + $0x40] sm:$0xff] %v370_v42 }
  0xf7   : > { %383 = vst [vmem:[%s647_s24 + $0x18] sm:$0xff] %v354_v45  ;;  %389 = vst [vmem:[%s647_s24 + $0x48] sm:$0xff] %v372_v46  ;;  %v357_v48 = vpop.f32.mrb[4].mxu0  ;;  %v375_v49 = vpop.f32.mrb[4].mxu1 }
  0xf8   : > { %v358_v50 = vadd.f32 %v357_v48, %v243_v27  ;;  %v376_v51 = vadd.f32 %v375_v49, %v258_v47  ;;  %v359_v52 = vpop.f32.mrb[5].mxu0  ;;  %v377_v53 = vpop.f32.mrb[5].mxu1 }
  0xf9   : > { %v360_v54 = vadd.f32 %v359_v52, %v243_v27  ;;  %v378_v55 = vadd.f32 %v377_v53, %v258_v47 }
  0xfa   : > { %384 = vst [vmem:[%s647_s24 + $0x20] sm:$0xff] %v358_v50  ;;  %390 = vst [vmem:[%s647_s24 + $0x50] sm:$0xff] %v376_v51 }
  0xfb   : > { %385 = vst [vmem:[%s647_s24 + $0x28] sm:$0xff] %v360_v54  ;;  %391 = vst [vmem:[%s647_s24 + $0x58] sm:$0xff] %v378_v55 }
  0xfc PF: > { %s13_s14 = sadd.s32 1, %s559_s14   ;;  %s674_s12 = smov %s555_s13 }
  0xfd   : > { %p10_p5 = scmp.ge.s32.totalorder %s13_s14, 4   ;;  %s675_s13 = smov %s677_s15 }
  0xff   :  { %12 = sbr.rel (!%p10_p5) target bundleno = 2 (0x2), region = 62 }

</bundles_post_ra>
